<compile_context>
chip_gen: v5e
topology: v5e:2x2
jax: 0.10.0
libtpu: 0.0.40
codegen_flags: <defaults>
</compile_context>

<pallas_src>
import functools

import jax
import jax.numpy as jnp
import numpy as np
from jax.experimental import pallas as pl
from jax.experimental.pallas import tpu as pltpu


def model_kernel(nproj, n_hooks, *refs):
    """Fused proj1 over all hooks -> softmax(alpha) mixture -> proj2 -> head."""
    g_ref, sm_ref, bias_ref = refs[0], refs[1], refs[2]
    n_w = 2 * nproj + 2                       # bf16 matmul weights
    wrefs = refs[3:3 + n_w]
    z_ref, p_ref = refs[3 + n_w], refs[4 + n_w]

    rows = g_ref.shape[0]                     # tile_n * n_hooks
    tile_n = rows // n_hooks
    p_pad = z_ref.shape[-1]

    biases = bias_ref[...]                    # [2*nproj+4, P_pad] f32
    sm = sm_ref[...]                          # [H, P_pad] f32 (softmax precomputed)

    # ---- proj1: weights shared across hooks -> ONE matmul per layer ---------
    x = g_ref[...]                            # [tile_n*H, Dbb] bf16
    for j in range(nproj):
        x = jnp.dot(x, wrefs[j][...], preferred_element_type=jnp.float32)
        x = jnp.maximum(x + biases[j:j + 1, :], 0.0)      # bias + ReLU in f32
        if j + 1 < nproj:
            x = x.astype(jnp.bfloat16)        # keep the MXU in bf16

    # ---- softmax(alpha)-weighted mixture over hooks --------------------------
    # lane dim unchanged; only the leading (batch*hook) dim is split.
    y3 = x.reshape(tile_n, n_hooks, p_pad)              # [tile_n, H, P_pad] f32
    z = jnp.sum(y3 * sm[None, :, :], axis=1)            # [tile_n, P_pad] f32

    # ---- proj2 ----------------------------------------------------------------
    h = z
    for j in range(nproj):
        h = jnp.dot(h.astype(jnp.bfloat16), wrefs[nproj + j][...],
                    preferred_element_type=jnp.float32)
        h = jnp.maximum(h + biases[nproj + j:nproj + j + 1, :], 0.0)
    z_ref[...] = h

    # ---- head: Lin+ReLU, Lin+ReLU (MXU); final [P,1] layer as a lane reduce --
    for j in range(2):
        h = jnp.dot(h.astype(jnp.bfloat16), wrefs[2 * nproj + j][...],
                    preferred_element_type=jnp.float32)
        h = jnp.maximum(h + biases[2 * nproj + j:2 * nproj + j + 1, :], 0.0)
    w3_row = biases[2 * nproj + 2:2 * nproj + 3, :]      # [1, P_pad] (zero padded)
    b3 = biases[2 * nproj + 3:2 * nproj + 4, 0:1]        # [1, 1]
    p_val = jnp.sum(h * w3_row, axis=-1, keepdims=True) + b3   # [tile_n, 1]
    # Lane-dense 128-wide store; column 0 is sliced outside.
    p_ref[...] = jnp.broadcast_to(p_val, p_ref.shape)


def _pad_cols(a, target):
    pad = target - a.shape[-1]
    if pad <= 0:
        return a
    return jnp.pad(a, [(0, 0)] * (a.ndim - 1) + [(0, pad)])


def model_forward(g, alpha, proj1_params, proj2_params, head_params):
    """g: [N, H, Dbb] stacked ln_2 CLS features; alpha: [1, H, P]."""
    N, H, Dbb = g.shape
    P = alpha.shape[-1]
    nproj = len(proj1_params)
    P_pad = max(128, ((P + 127) // 128) * 128)   # full-lane matmul / unmasked stores
    P_LANES = 128                                # lane-dense slab for the scalar head

    # Free row-major merge of (N, H): batch element n's hooks are rows n*H..n*H+H-1.
    # TODO(synk): cast to bf16 where the backbone produces g so no extra pass is needed.
    g2 = g.reshape(N * H, Dbb).astype(jnp.bfloat16)

    # softmax over hooks is input-independent: compute once in the wrapper.
    sm = _pad_cols(jax.nn.softmax(alpha[0].astype(jnp.float32), axis=0), P_pad)

    # ---- weights: bf16 matmul weights; every bias row plus the final [P,1]
    #      matvec row / scalar bias packed into one f32 [2*nproj+4, P_pad] matrix.
    mm_weights = []
    bias_rows = []

    def add_linear(w, b, pad_rows):
        wp = _pad_cols(w.astype(jnp.float32), P_pad)
        if pad_rows and wp.shape[0] < P_pad:
            wp = jnp.pad(wp, [(0, P_pad - wp.shape[0]), (0, 0)])
        mm_weights.append(wp.astype(jnp.bfloat16))
        bias_rows.append(_pad_cols(b.astype(jnp.float32).reshape(1, -1), P_pad))

    for i, (w, b) in enumerate(proj1_params):
        add_linear(w, b, pad_rows=(i > 0))
    for (w, b) in proj2_params:
        add_linear(w, b, pad_rows=True)
    for (w, b) in head_params[:2]:
        add_linear(w, b, pad_rows=True)
    w3, b3 = head_params[2]
    bias_rows.append(_pad_cols(w3.astype(jnp.float32).reshape(1, -1), P_pad))
    bias_rows.append(jnp.full((1, P_pad), jnp.asarray(b3, jnp.float32).reshape(())))
    bias_mat = jnp.concatenate(bias_rows, axis=0)        # [2*nproj+4, P_pad] f32

    # ---- generation-aware tile sizing ----------------------------------------
    try:
        vmem_cap = int(pltpu.get_tpu_info().vmem_capacity_bytes)
    except Exception:
        vmem_cap = 64 << 20
    budget = vmem_cap * 3 // 4          # ~96 MiB on v5e/v6e, ~48 MiB on v7x

    w_bytes = (sum(int(np.prod(a.shape)) * 2 for a in mm_weights)
               + int(bias_mat.size) * 4 + int(sm.size) * 4)   # resident (Buffered(1))
    # per batch row: bf16 g tile (double-buffered) + f32 proj1 activation slabs
    # (~2 live copies + the mixture copy) + f32 z/p output tiles (double-buffered)
    per_row = 2 * H * Dbb * 2 + 3 * H * P_pad * 4 + 2 * (P_pad + P_LANES) * 4
    avail = budget - w_bytes - (4 << 20)
    max_tile = max(8, (avail // per_row) // 8 * 8)

    tile_n = N if N <= max_tile else int(max_tile)
    grid = (pl.cdiv(N, tile_n),)        # partial last tile: OOB rows masked on write

    g_tile_bytes = tile_n * H * Dbb * 2
    act_bytes = 3 * tile_n * H * P_pad * 4
    out_bytes = tile_n * (P_pad + P_LANES) * 4
    vmem_limit = 2 * g_tile_bytes + act_bytes + 2 * out_bytes + w_bytes + (4 << 20)
    vmem_limit = int(min(max(vmem_limit, 16 << 20), budget))

    resident = pl.Buffered(1)           # constant-index inputs: no double buffer
    in_specs = [
        pl.BlockSpec((tile_n * H, Dbb), lambda i: (i, 0)),                 # g tile
        pl.BlockSpec(sm.shape, lambda i: (0, 0), pipeline_mode=resident),
        pl.BlockSpec(bias_mat.shape, lambda i: (0, 0), pipeline_mode=resident),
    ]
    for a in mm_weights:
        in_specs.append(pl.BlockSpec(a.shape, lambda i: (0, 0),
                                     pipeline_mode=resident))

    out_specs = (pl.BlockSpec((tile_n, P_pad), lambda i: (i, 0)),          # z
                 pl.BlockSpec((tile_n, P_LANES), lambda i: (i, 0)))        # p slab
    out_shape = (jax.ShapeDtypeStruct((N, P_pad), jnp.float32),
                 jax.ShapeDtypeStruct((N, P_LANES), jnp.float32))

    z_pad, p_slab = pl.pallas_call(
        functools.partial(model_kernel, nproj, H),
        grid=grid,
        in_specs=in_specs,
        out_specs=out_specs,
        out_shape=out_shape,
        compiler_params=pltpu.CompilerParams(
            dimension_semantics=("parallel",),   # batch tiles shard across TCs (v7x)
            vmem_limit_bytes=vmem_limit),
    )(g2, sm, bias_mat, *mm_weights)

    p = p_slab[:, :1]        # column 0 of the lane-dense slab
    z = z_pad[:, :P]         # drop lane padding
    return p, z


def reference_forward(g, alpha, proj1_params, proj2_params, head_params):
    x = g.astype(jnp.float32)
    for w, b in proj1_params:
        x = jax.nn.relu(x @ w + b)
    sm = jax.nn.softmax(alpha, axis=1)
    z = jnp.sum(sm * x, axis=1)
    for w, b in proj2_params:
        z = jax.nn.relu(z @ w + b)
    h = z
    for i, (w, b) in enumerate(head_params):
        h = h @ w + b
        if i < 2:
            h = jax.nn.relu(h)
    return h, z


if __name__ == "__main__":
    # Small synthetic configuration consistent with the module:
    #   batch N=2, n_hooks=4 (ln_2 hooks), backbone feature dim=32, proj_dim=32,
    #   nproj=2.
    N, H, DBB, PROJ, NPROJ = 2, 4, 32, 32, 2

    key = jax.random.PRNGKey(0)
    keys = iter(jax.random.split(key, 64))

    def lin(kin, kout):
        w = jax.random.normal(next(keys), (kin, kout), jnp.float32) * 0.1
        b = jax.random.normal(next(keys), (kout,), jnp.float32) * 0.05
        return w, b

    # hook features (stand-in for CLIP ln_2 CLS-token outputs)
    g = jax.random.normal(next(keys), (N, H, DBB), jnp.float32)
    alpha = jax.random.normal(next(keys), (1, H, PROJ), jnp.float32)

    proj1_params = [lin(DBB if i == 0 else PROJ, PROJ) for i in range(NPROJ)]
    proj2_params = [lin(PROJ, PROJ) for _ in range(NPROJ)]
    head_params = [lin(PROJ, PROJ), lin(PROJ, PROJ), lin(PROJ, 1)]

    p, z = model_forward(g, alpha, proj1_params, proj2_params, head_params)
    jax.block_until_ready((p, z))

    p_ref, z_ref = reference_forward(g, alpha, proj1_params, proj2_params,
                                     head_params)
    # bf16 matmul inputs (f32 accumulation) -> relaxed tolerance vs pure-f32 ref
    np.testing.assert_allclose(np.asarray(p), np.asarray(p_ref),
                               rtol=5e-2, atol=5e-2)
    np.testing.assert_allclose(np.asarray(z), np.asarray(z_ref),
                               rtol=5e-2, atol=5e-2)
    assert p.shape == (N, 1) and z.shape == (N, PROJ)
    print("KERNEL_OK")
</pallas_src>

<mosaic_0001>
module attributes {stable_mosaic.version = 11 : i64} {
  func.func @model_kernel(%arg0: i32, %arg1: memref<8x32xbf16, #tpu.memory_space<vmem>>, %arg2: memref<4x128xf32, #tpu.memory_space<vmem>>, %arg3: memref<8x128xf32, #tpu.memory_space<vmem>>, %arg4: memref<32x128xbf16, #tpu.memory_space<vmem>>, %arg5: memref<128x128xbf16, #tpu.memory_space<vmem>>, %arg6: memref<128x128xbf16, #tpu.memory_space<vmem>>, %arg7: memref<128x128xbf16, #tpu.memory_space<vmem>>, %arg8: memref<128x128xbf16, #tpu.memory_space<vmem>>, %arg9: memref<128x128xbf16, #tpu.memory_space<vmem>>, %arg10: memref<2x128xf32, #tpu.memory_space<vmem>>, %arg11: memref<2x128xf32, #tpu.memory_space<vmem>>) attributes {dimension_semantics = [#tpu.dimension_semantics<parallel>], iteration_bounds = array<i64: 1>, scalar_prefetch = 0 : i64, scratch_operands = 0 : i64, tpu.core_type = #tpu.core_type<tc>, window_params = [{transform_indices = @transform_0, window_bounds = array<i64: 8, 32>}, {pipeline_mode = #tpu.pipeline_mode<synchronous>, transform_indices = @transform_1, window_bounds = array<i64: 4, 128>}, {pipeline_mode = #tpu.pipeline_mode<synchronous>, transform_indices = @transform_2, window_bounds = array<i64: 8, 128>}, {pipeline_mode = #tpu.pipeline_mode<synchronous>, transform_indices = @transform_3, window_bounds = array<i64: 32, 128>}, {pipeline_mode = #tpu.pipeline_mode<synchronous>, transform_indices = @transform_4, window_bounds = array<i64: 128, 128>}, {pipeline_mode = #tpu.pipeline_mode<synchronous>, transform_indices = @transform_5, window_bounds = array<i64: 128, 128>}, {pipeline_mode = #tpu.pipeline_mode<synchronous>, transform_indices = @transform_6, window_bounds = array<i64: 128, 128>}, {pipeline_mode = #tpu.pipeline_mode<synchronous>, transform_indices = @transform_7, window_bounds = array<i64: 128, 128>}, {pipeline_mode = #tpu.pipeline_mode<synchronous>, transform_indices = @transform_8, window_bounds = array<i64: 128, 128>}, {transform_indices = @transform_9, window_bounds = array<i64: 2, 128>}, {transform_indices = @transform_10, window_bounds = array<i64: 2, 128>}]} {
    %c0 = arith.constant 0 : index
    %c0_0 = arith.constant 0 : index
    %0 = vector.load %arg3[%c0, %c0_0] : memref<8x128xf32, #tpu.memory_space<vmem>>, vector<8x128xf32>
    %c0_1 = arith.constant 0 : index
    %c0_2 = arith.constant 0 : index
    %1 = vector.load %arg2[%c0_1, %c0_2] : memref<4x128xf32, #tpu.memory_space<vmem>>, vector<4x128xf32>
    %c0_3 = arith.constant 0 : index
    %c0_4 = arith.constant 0 : index
    %2 = vector.load %arg1[%c0_3, %c0_4] : memref<8x32xbf16, #tpu.memory_space<vmem>>, vector<8x32xbf16>
    %c0_5 = arith.constant 0 : index
    %c0_6 = arith.constant 0 : index
    %3 = vector.load %arg4[%c0_5, %c0_6] : memref<32x128xbf16, #tpu.memory_space<vmem>>, vector<32x128xbf16>
    %cst = arith.constant dense<0.000000e+00> : vector<8x128xf32>
    %4 = tpu.matmul %2, %3, %cst {dimension_numbers = #tpu.dot_dimension_numbers<[1], [0], [0], [1], [0, 0, 1, 1], [], []>} : vector<8x32xbf16>, vector<32x128xbf16>, vector<8x128xf32> -> vector<8x128xf32>
    %5 = vector.extract_strided_slice %0 {offsets = [0, 0], sizes = [1, 128], strides = [1, 1]} : vector<8x128xf32> to vector<1x128xf32>
    %6 = vector.broadcast %5 : vector<1x128xf32> to vector<8x128xf32>
    %7 = arith.addf %4, %6 : vector<8x128xf32>
    %cst_7 = arith.constant 0.000000e+00 : f32
    %8 = vector.broadcast %cst_7 : f32 to vector<8x128xf32>
    %9 = arith.maximumf %7, %8 : vector<8x128xf32>
    %10 = arith.truncf %9 : vector<8x128xf32> to vector<8x128xbf16>
    %c0_8 = arith.constant 0 : index
    %c0_9 = arith.constant 0 : index
    %11 = vector.load %arg5[%c0_8, %c0_9] : memref<128x128xbf16, #tpu.memory_space<vmem>>, vector<128x128xbf16>
    %cst_10 = arith.constant dense<0.000000e+00> : vector<8x128xf32>
    %12 = tpu.matmul %10, %11, %cst_10 {dimension_numbers = #tpu.dot_dimension_numbers<[1], [0], [0], [1], [0, 0, 1, 1], [], []>} : vector<8x128xbf16>, vector<128x128xbf16>, vector<8x128xf32> -> vector<8x128xf32>
    %13 = vector.extract_strided_slice %0 {offsets = [1, 0], sizes = [1, 128], strides = [1, 1]} : vector<8x128xf32> to vector<1x128xf32>
    %14 = vector.broadcast %13 : vector<1x128xf32> to vector<8x128xf32>
    %15 = arith.addf %12, %14 : vector<8x128xf32>
    %cst_11 = arith.constant 0.000000e+00 : f32
    %16 = vector.broadcast %cst_11 : f32 to vector<8x128xf32>
    %17 = arith.maximumf %15, %16 : vector<8x128xf32>
    %18 = vector.shape_cast %17 : vector<8x128xf32> to vector<2x4x128xf32>
    %19 = vector.shape_cast %1 : vector<4x128xf32> to vector<1x4x128xf32>
    %20 = vector.broadcast %19 : vector<1x4x128xf32> to vector<2x4x128xf32>
    %21 = arith.mulf %18, %20 : vector<2x4x128xf32>
    %cst_12 = arith.constant dense<0.000000e+00> : vector<2x128xf32>
    %22 = vector.multi_reduction <add>, %21, %cst_12 [1] : vector<2x4x128xf32> to vector<2x128xf32>
    %23 = arith.truncf %22 : vector<2x128xf32> to vector<2x128xbf16>
    %c0_13 = arith.constant 0 : index
    %c0_14 = arith.constant 0 : index
    %24 = vector.load %arg6[%c0_13, %c0_14] : memref<128x128xbf16, #tpu.memory_space<vmem>>, vector<128x128xbf16>
    %cst_15 = arith.constant dense<0.000000e+00> : vector<2x128xf32>
    %25 = tpu.matmul %23, %24, %cst_15 {dimension_numbers = #tpu.dot_dimension_numbers<[1], [0], [0], [1], [0, 0, 1, 1], [], []>} : vector<2x128xbf16>, vector<128x128xbf16>, vector<2x128xf32> -> vector<2x128xf32>
    %26 = vector.extract_strided_slice %0 {offsets = [2, 0], sizes = [1, 128], strides = [1, 1]} : vector<8x128xf32> to vector<1x128xf32>
    %27 = vector.broadcast %26 : vector<1x128xf32> to vector<2x128xf32>
    %28 = arith.addf %25, %27 : vector<2x128xf32>
    %cst_16 = arith.constant 0.000000e+00 : f32
    %29 = vector.broadcast %cst_16 : f32 to vector<2x128xf32>
    %30 = arith.maximumf %28, %29 : vector<2x128xf32>
    %31 = arith.truncf %30 : vector<2x128xf32> to vector<2x128xbf16>
    %c0_17 = arith.constant 0 : index
    %c0_18 = arith.constant 0 : index
    %32 = vector.load %arg7[%c0_17, %c0_18] : memref<128x128xbf16, #tpu.memory_space<vmem>>, vector<128x128xbf16>
    %cst_19 = arith.constant dense<0.000000e+00> : vector<2x128xf32>
    %33 = tpu.matmul %31, %32, %cst_19 {dimension_numbers = #tpu.dot_dimension_numbers<[1], [0], [0], [1], [0, 0, 1, 1], [], []>} : vector<2x128xbf16>, vector<128x128xbf16>, vector<2x128xf32> -> vector<2x128xf32>
    %34 = vector.extract_strided_slice %0 {offsets = [3, 0], sizes = [1, 128], strides = [1, 1]} : vector<8x128xf32> to vector<1x128xf32>
    %35 = vector.broadcast %34 : vector<1x128xf32> to vector<2x128xf32>
    %36 = arith.addf %33, %35 : vector<2x128xf32>
    %cst_20 = arith.constant 0.000000e+00 : f32
    %37 = vector.broadcast %cst_20 : f32 to vector<2x128xf32>
    %38 = arith.maximumf %36, %37 : vector<2x128xf32>
    %c0_21 = arith.constant 0 : index
    %c0_22 = arith.constant 0 : index
    %39 = vector.load %arg10[%c0_21, %c0_22] : memref<2x128xf32, #tpu.memory_space<vmem>>, vector<2x128xf32>
    tpu.vector_store %arg10[%c0_21, %c0_22], %38 {strides = array<i32>} : memref<2x128xf32, #tpu.memory_space<vmem>>, vector<2x128xf32>,
    %40 = arith.truncf %38 : vector<2x128xf32> to vector<2x128xbf16>
    %c0_23 = arith.constant 0 : index
    %c0_24 = arith.constant 0 : index
    %41 = vector.load %arg8[%c0_23, %c0_24] : memref<128x128xbf16, #tpu.memory_space<vmem>>, vector<128x128xbf16>
    %cst_25 = arith.constant dense<0.000000e+00> : vector<2x128xf32>
    %42 = tpu.matmul %40, %41, %cst_25 {dimension_numbers = #tpu.dot_dimension_numbers<[1], [0], [0], [1], [0, 0, 1, 1], [], []>} : vector<2x128xbf16>, vector<128x128xbf16>, vector<2x128xf32> -> vector<2x128xf32>
    %43 = vector.extract_strided_slice %0 {offsets = [4, 0], sizes = [1, 128], strides = [1, 1]} : vector<8x128xf32> to vector<1x128xf32>
    %44 = vector.broadcast %43 : vector<1x128xf32> to vector<2x128xf32>
    %45 = arith.addf %42, %44 : vector<2x128xf32>
    %cst_26 = arith.constant 0.000000e+00 : f32
    %46 = vector.broadcast %cst_26 : f32 to vector<2x128xf32>
    %47 = arith.maximumf %45, %46 : vector<2x128xf32>
    %48 = arith.truncf %47 : vector<2x128xf32> to vector<2x128xbf16>
    %c0_27 = arith.constant 0 : index
    %c0_28 = arith.constant 0 : index
    %49 = vector.load %arg9[%c0_27, %c0_28] : memref<128x128xbf16, #tpu.memory_space<vmem>>, vector<128x128xbf16>
    %cst_29 = arith.constant dense<0.000000e+00> : vector<2x128xf32>
    %50 = tpu.matmul %48, %49, %cst_29 {dimension_numbers = #tpu.dot_dimension_numbers<[1], [0], [0], [1], [0, 0, 1, 1], [], []>} : vector<2x128xbf16>, vector<128x128xbf16>, vector<2x128xf32> -> vector<2x128xf32>
    %51 = vector.extract_strided_slice %0 {offsets = [5, 0], sizes = [1, 128], strides = [1, 1]} : vector<8x128xf32> to vector<1x128xf32>
    %52 = vector.broadcast %51 : vector<1x128xf32> to vector<2x128xf32>
    %53 = arith.addf %50, %52 : vector<2x128xf32>
    %cst_30 = arith.constant 0.000000e+00 : f32
    %54 = vector.broadcast %cst_30 : f32 to vector<2x128xf32>
    %55 = arith.maximumf %53, %54 : vector<2x128xf32>
    %56 = vector.extract_strided_slice %0 {offsets = [6, 0], sizes = [1, 128], strides = [1, 1]} : vector<8x128xf32> to vector<1x128xf32>
    %57 = vector.extract_strided_slice %0 {offsets = [7, 0], sizes = [1, 1], strides = [1, 1]} : vector<8x128xf32> to vector<1x1xf32>
    %58 = vector.broadcast %56 : vector<1x128xf32> to vector<2x128xf32>
    %59 = arith.mulf %55, %58 : vector<2x128xf32>
    %cst_31 = arith.constant dense<0.000000e+00> : vector<2xf32>
    %60 = vector.multi_reduction <add>, %59, %cst_31 [1] : vector<2x128xf32> to vector<2xf32>
    %61 = vector.shape_cast %60 : vector<2xf32> to vector<2x1xf32>
    %62 = vector.broadcast %57 : vector<1x1xf32> to vector<2x1xf32>
    %63 = arith.addf %61, %62 : vector<2x1xf32>
    %64 = vector.shape_cast %63 : vector<2x1xf32> to vector<2x1xf32>
    %65 = vector.broadcast %64 : vector<2x1xf32> to vector<2x128xf32>
    %c0_32 = arith.constant 0 : index
    %c0_33 = arith.constant 0 : index
    %66 = vector.load %arg11[%c0_32, %c0_33] : memref<2x128xf32, #tpu.memory_space<vmem>>, vector<2x128xf32>
    tpu.vector_store %arg11[%c0_32, %c0_33], %65 {strides = array<i32>} : memref<2x128xf32, #tpu.memory_space<vmem>>, vector<2x128xf32>,
    return
  }
  func.func @transform_0(%arg0: i32) -> (i32, i32) {
    %c0_i32 = arith.constant 0 : i32
    %c0_i32_0 = arith.constant 0 : i32
    return %arg0, %c0_i32 : i32, i32
  }
  func.func @transform_1(%arg0: i32) -> (i32, i32) {
    %c0_i32 = arith.constant 0 : i32
    %c0_i32_0 = arith.constant 0 : i32
    %c0_i32_1 = arith.constant 0 : i32
    return %c0_i32, %c0_i32_0 : i32, i32
  }
  func.func @transform_2(%arg0: i32) -> (i32, i32) {
    %c0_i32 = arith.constant 0 : i32
    %c0_i32_0 = arith.constant 0 : i32
    %c0_i32_1 = arith.constant 0 : i32
    return %c0_i32, %c0_i32_0 : i32, i32
  }
  func.func @transform_3(%arg0: i32) -> (i32, i32) {
    %c0_i32 = arith.constant 0 : i32
    %c0_i32_0 = arith.constant 0 : i32
    %c0_i32_1 = arith.constant 0 : i32
    return %c0_i32, %c0_i32_0 : i32, i32
  }
  func.func @transform_4(%arg0: i32) -> (i32, i32) {
    %c0_i32 = arith.constant 0 : i32
    %c0_i32_0 = arith.constant 0 : i32
    %c0_i32_1 = arith.constant 0 : i32
    return %c0_i32, %c0_i32_0 : i32, i32
  }
  func.func @transform_5(%arg0: i32) -> (i32, i32) {
    %c0_i32 = arith.constant 0 : i32
    %c0_i32_0 = arith.constant 0 : i32
    %c0_i32_1 = arith.constant 0 : i32
    return %c0_i32, %c0_i32_0 : i32, i32
  }
  func.func @transform_6(%arg0: i32) -> (i32, i32) {
    %c0_i32 = arith.constant 0 : i32
    %c0_i32_0 = arith.constant 0 : i32
    %c0_i32_1 = arith.constant 0 : i32
    return %c0_i32, %c0_i32_0 : i32, i32
  }
  func.func @transform_7(%arg0: i32) -> (i32, i32) {
    %c0_i32 = arith.constant 0 : i32
    %c0_i32_0 = arith.constant 0 : i32
    %c0_i32_1 = arith.constant 0 : i32
    return %c0_i32, %c0_i32_0 : i32, i32
  }
  func.func @transform_8(%arg0: i32) -> (i32, i32) {
    %c0_i32 = arith.constant 0 : i32
    %c0_i32_0 = arith.constant 0 : i32
    %c0_i32_1 = arith.constant 0 : i32
    return %c0_i32, %c0_i32_0 : i32, i32
  }
  func.func @transform_9(%arg0: i32) -> (i32, i32) {
    %c0_i32 = arith.constant 0 : i32
    %c0_i32_0 = arith.constant 0 : i32
    return %arg0, %c0_i32 : i32, i32
  }
  func.func @transform_10(%arg0: i32) -> (i32, i32) {
    %c0_i32 = arith.constant 0 : i32
    %c0_i32_0 = arith.constant 0 : i32
    return %arg0, %c0_i32 : i32, i32
  }
}

</mosaic_0001>

<bundles_post_ra>
// kernel: tpu_custom_call.1
= control target key start
LH: loop header
LB: loop body
LE: loop exit
PB: predicated region body
PF: predicated region fallthrough
CT: control target
= control target key end

     0   :  { %16 = vsyncpa [#allocation3], 0  ;;  %s1324_s0 = inlined_call_operand.hbm [shape: bf16[8,32], index: 0, kind: input, shape index: {}]   ;;  %s1325_s1 = inlined_call_operand.hbm [shape: f32[4,128], index: 1, kind: input, shape index: {}]   ;;  %s1326_s2 = inlined_call_operand.hbm [shape: f32[8,128], index: 2, kind: input, shape index: {}]   ;;  %s1327_s3 = inlined_call_operand.hbm [shape: bf16[32,128], index: 3, kind: input, shape index: {}]   ;;  %s1328_s4 = inlined_call_operand.hbm [shape: bf16[128,128], index: 4, kind: input, shape index: {}]   ;;  %s1329_s5 = inlined_call_operand.hbm [shape: bf16[128,128], index: 5, kind: input, shape index: {}]   ;;  %s1330_s6 = inlined_call_operand.hbm [shape: bf16[128,128], index: 6, kind: input, shape index: {}]   ;;  %s1331_s7 = inlined_call_operand.hbm [shape: bf16[128,128], index: 7, kind: input, shape index: {}]   ;;  %s1332_s8 = inlined_call_operand.hbm [shape: bf16[128,128], index: 8, kind: input, shape index: {}]   ;;  %s1333_s9 = inlined_call_operand.hbm [shape: f32[2,128], index: 9, kind: output, shape index: {0}]   ;;  %s1334_s10 = inlined_call_operand.hbm [shape: f32[2,128], index: 10, kind: output, shape index: {1}]  }
   0x1   :  { %17 = vsyncpa [#allocation6], 0 }
   0x2   :  { %18 = vsyncpa [#allocation9], 0 }
   0x3   :  { %19 = vsyncpa [#allocation12], 0 }
   0x4   :  { %20 = vsyncpa [#allocation15], 0 }
   0x5   :  { %21 = vsyncpa [#allocation4], 0  ;;  %s39_s15 = sshll.u32 %s1325_s1, 4  ;;  %s40_s15 = int_to_ptr.hbm [resolvable:$true] %s39_s15 }
   0x6   :  { %22 = vsyncpa [#allocation19], 0  ;;  %s1194_s16 = smov [#allocation5]   ;;  %s60_s20 = sshll.u32 %s1327_s3, 4  ;;  %s61_s20 = int_to_ptr.hbm [resolvable:$true] %s60_s20 }
   0x7   :  { %s41_s17 = sshll.u32 %s1194_s16, 4  ;;  %s1195_s21 = smov [#allocation8]   ;;  %s42_s17 = int_to_ptr.vmem [resolvable:$true] %s41_s17 }
   0x8   :  { %44 = dma.hbm_to_vmem [thread:$0]  %s40_s15, 64, %s42_s17, [#allocation6]  }
   0x9   :  { %s62_s22 = sshll.u32 %s1195_s21, 4  ;;  %s1196_s23 = smov 64   ;;  %s63_s22 = int_to_ptr.vmem [resolvable:$true] %s62_s22 }
   0xa   :  { %s1197_s24 = smov 4   ;;  %s86_s26 = sshll.u32 %s1329_s5, 4  ;;  %s87_s26 = int_to_ptr.hbm [resolvable:$true] %s86_s26 }
   0xb   :  { %68 = dma.hbm_to_vmem [thread:$0]  %s61_s20, 256, %s63_s22, [#allocation9], %s1196_s23, %s1196_s23, %s1197_s24  }
   0xc   :  { %s1198_s27 = smov [#allocation11]   ;;  %s112_s30 = sshll.u32 %s1331_s7, 4  ;;  %s113_s30 = int_to_ptr.hbm [resolvable:$true] %s112_s30 }
   0xd   :  { %s88_s28 = sshll.u32 %s1198_s27, 4  ;;  %s1199_s11 = smov [#allocation14]   ;;  %s89_s28 = int_to_ptr.vmem [resolvable:$true] %s88_s28 }
   0xe   :  { %94 = dma.hbm_to_vmem [thread:$0]  %s87_s26, 1024, %s89_s28, [#allocation12], %s1196_s23, %s1196_s23, %s1197_s24  }
   0xf   :  { %s114_s12 = sshll.u32 %s1199_s11, 4  ;;  %s28_s15 = sshll.u32 %s1324_s0, 4  ;;  %s115_s12 = int_to_ptr.vmem [resolvable:$true] %s114_s12  ;;  %s29_s15 = int_to_ptr.hbm [resolvable:$true] %s28_s15 }
  0x10   :  { %120 = dma.hbm_to_vmem [thread:$0]  %s113_s30, 1024, %s115_s12, [#allocation15], %s1196_s23, %s1196_s23, %s1197_s24  }
  0x11   :  { %s50_s7 = sshll.u32 %s1326_s2, 4  ;;  %s1200_s17 = smov [#allocation2]   ;;  %s51_s7 = int_to_ptr.hbm [resolvable:$true] %s50_s7 }
  0x12   :  { %s30_s18 = sshll.u32 %s1200_s17, 4  ;;  %s1201_s19 = smov [#allocation7]   ;;  %s31_s18 = int_to_ptr.vmem [resolvable:$true] %s30_s18 }
  0x13   :  { %33 = dma.hbm_to_vmem [thread:$0]  %s29_s15, 64, %s31_s18, [#allocation3]  }
  0x14   :  { %s52_s20 = sshll.u32 %s1201_s19, 4  ;;  %s73_s0 = sshll.u32 %s1328_s4, 4  ;;  %s53_s20 = int_to_ptr.vmem [resolvable:$true] %s52_s20  ;;  %s74_s0 = int_to_ptr.hbm [resolvable:$true] %s73_s0 }
  0x15   :  { %55 = dma.hbm_to_vmem [thread:$0]  %s51_s7, 128, %s53_s20, [#allocation6]  }
  0x16   :  { %s99_s26 = sshll.u32 %s1330_s6, 4  ;;  %s1202_s27 = smov [#allocation10]   ;;  %s100_s26 = int_to_ptr.hbm [resolvable:$true] %s99_s26 }
  0x17   :  { %s75_s2 = sshll.u32 %s1202_s27, 4  ;;  %s1203_s28 = smov [#allocation13]   ;;  %s76_s2 = int_to_ptr.vmem [resolvable:$true] %s75_s2 }
  0x18   :  { %81 = dma.hbm_to_vmem [thread:$0]  %s74_s0, 1024, %s76_s2, [#allocation9], %s1196_s23, %s1196_s23, %s1197_s24  }
  0x19   :  { %s101_s3 = sshll.u32 %s1203_s28, 4  ;;  %s125_s4 = sshll.u32 %s1332_s8, 4  ;;  %s102_s3 = int_to_ptr.vmem [resolvable:$true] %s101_s3  ;;  %s126_s4 = int_to_ptr.hbm [resolvable:$true] %s125_s4 }
  0x1a   :  { %107 = dma.hbm_to_vmem [thread:$0]  %s100_s26, 1024, %s102_s3, [#allocation12], %s1196_s23, %s1196_s23, %s1197_s24  }
  0x1b   :  { %s1204_s6 = smov [#allocation16]  }
  0x1c   :  { %s127_s11 = sshll.u32 %s1204_s6, 4  ;;  %s128_s11 = int_to_ptr.vmem [resolvable:$true] %s127_s11 }
  0x1d   :  { %133 = dma.hbm_to_vmem [thread:$0]  %s126_s4, 1024, %s128_s11, [#allocation15], %s1196_s23, %s1196_s23, %s1197_s24  }
  0x1e   :  { %1180 = dma.done.wait [#allocation3], 64  }
  0x1f   :  { %1181 = vsyncadd [#allocation3], 4294967232 }
  0x20   :  { %1182 = dma.done.wait [#allocation6], 192  }
  0x21   :  { %1183 = vsyncadd [#allocation6], 4294967104 }
  0x22   :  { %1184 = dma.done.wait [#allocation9], 1280  }
  0x23   :  { %1185 = vsyncadd [#allocation9], 4294966016 }
  0x24   :  { %1186 = dma.done.wait [#allocation12], 2048  }
  0x25   :  { %1187 = vsyncadd [#allocation12], 4294965248 }
  0x26   :  { %1188 = dma.done.wait [#allocation15], 2048  }
  0x27   :  { %1189 = vsyncadd [#allocation15], 4294965248  ;;  %v860_v0 = vld [vmem:[#allocation8 + $0x8] sm:$0xff]  ;;  %v859_v2 = vld [vmem:[#allocation8] sm:$0xff]  ;;  %vm191_vm0 = vcmask 261120   ;;  %vm294_vm1 = vcmask 1043456  }
  0x28   :  { %v868_v1 = vld [vmem:[#allocation10 + $0x38] sm:$0xff]  ;;  %201 = vmatpush.bf16.msra.mxu0 %v860_v0  ;;  %v867_v3 = vld [vmem:[#allocation10 + $0x30] sm:$0xff]  ;;  %v173_v4 = vld [vmem:[#allocation2] sm:$0xf]  ;;  %vm332_vm2 = vcmask 1041409   ;;  %vm641_vm3 = vcmask 1041408  }
  0x29   :  { %275 = vmatpush.bf16.msra.mxu1 %v868_v1  ;;  %v866_v5 = vld [vmem:[#allocation10 + $0x28] sm:$0xff]  ;;  %v865_v6 = vld [vmem:[#allocation10 + $0x20] sm:$0xff]  ;;  %v864_v7 = vld [vmem:[#allocation10 + $0x18] sm:$0xff]  ;;  %s1206_s8 = smov [#allocation17]   ;;  %s660_s13 = sshll.u32 %s1333_s9, 4  ;;  %s661_s13 = int_to_ptr.hbm [resolvable:$true] %s660_s13 }
  0x2a   :  { %v863_v8 = vld [vmem:[#allocation10 + $0x10] sm:$0xff]  ;;  %v862_v9 = vld [vmem:[#allocation10 + $0x8] sm:$0xff]  ;;  %v861_v10 = vld [vmem:[#allocation10] sm:$0xff]  ;;  %s658_s23 = sshll.u32 %s1206_s8, 4  ;;  %s1207_s14 = smov [#allocation18]   ;;  %s659_s23 = int_to_ptr.vmem [resolvable:$true] %s658_s23 }
  0x2b   :  { %v876_v11 = vld [vmem:[#allocation11 + $0x38] sm:$0xff]  ;;  %v1308_v12 = vld [vmem:[#allocation7] sm:$0xff]  ;;  %v875_v19 = vld [vmem:[#allocation11 + $0x30] sm:$0xff]  ;;  %s669_s15 = sshll.u32 %s1207_s14, 4  ;;  %s671_s7 = sshll.u32 %s1334_s10, 4  ;;  %s670_s15 = int_to_ptr.vmem [resolvable:$true] %s669_s15  ;;  %s672_s7 = int_to_ptr.hbm [resolvable:$true] %s671_s7 }
  0x2c   :  { %202 = vmatpush.bf16.msra.mxu0 %v859_v2  ;;  %384 = vmatpush.bf16.msra.mxu2 %v876_v11  ;;  %v178_v13 = vperm.slane %v1308_v12, 0  ;;  %v874_v20 = vld [vmem:[#allocation11 + $0x28] sm:$0xff]  ;;  %v873_v21 = vld [vmem:[#allocation11 + $0x20] sm:$0xff]  ;;  %v872_v22 = vld [vmem:[#allocation11 + $0x18] sm:$0xff]  ;;  %v226_v26 = vperm.slane %v1308_v12, 1 }
  0x2d   :  { %276 = vmatpush.bf16.msra.mxu1 %v867_v3  ;;  %v871_v23 = vld [vmem:[#allocation11 + $0x10] sm:$0xff]  ;;  %v870_v24 = vld [vmem:[#allocation11 + $0x8] sm:$0xff]  ;;  %v869_v25 = vld [vmem:[#allocation11] sm:$0xff] }
  0x2e   :  { %v884_v27 = vld [vmem:[#allocation13 + $0x38] sm:$0xff]  ;;  %v883_v28 = vld [vmem:[#allocation13 + $0x30] sm:$0xff]  ;;  %v172_v31 = vld [vmem:[#allocation5] sm:$0xf] }
  0x2f   :  { %698 = vmatmul.msk.bf16.vlgmr.msra.gmra.mxu0 %vm191_vm0, %v173_v4  ;;  %464 = vmatpush.bf16.msra.mxu3 %v884_v27  ;;  %v882_v33 = vld [vmem:[#allocation13 + $0x28] sm:$0xff]  ;;  %v881_v38 = vld [vmem:[#allocation13 + $0x20] sm:$0xff]  ;;  %v880_v44 = vld [vmem:[#allocation13 + $0x18] sm:$0xff] }
  0x30   :  { %385 = vmatpush.bf16.msra.mxu2 %v875_v19  ;;  %v879_v49 = vld [vmem:[#allocation13 + $0x10] sm:$0xff]  ;;  %v878_v61 = vld [vmem:[#allocation13 + $0x8] sm:$0xff]  ;;  %v877_v62 = vld [vmem:[#allocation13] sm:$0xff] }
  0x31   :  { %277 = vmatpush.bf16.msra.mxu1 %v866_v5  ;;  %v892_v63 = vld [vmem:[#allocation14 + $0x38] sm:$0xff]  ;;  %v891_v0 = vld [vmem:[#allocation14 + $0x30] sm:$0xff]  ;;  %v890_v1 = vld [vmem:[#allocation14 + $0x28] sm:$0xff]  ;;  %v327_v5 = vperm.slane %v1308_v12, 2 }
  0x32   :  { %545 = vmatpush.bf16.msrb.mxu0 %v892_v63  ;;  %v889_v2 = vld [vmem:[#allocation14 + $0x20] sm:$0xff]  ;;  %v888_v3 = vld [vmem:[#allocation14 + $0x18] sm:$0xff]  ;;  %v887_v4 = vld [vmem:[#allocation14 + $0x10] sm:$0xff] }
  0x33   :  { %465 = vmatpush.bf16.msra.mxu3 %v883_v28  ;;  %v886_v11 = vld [vmem:[#allocation14 + $0x8] sm:$0xff]  ;;  %v895_v19 = vld [vmem:[#allocation16 + $0x10] sm:$0xff]  ;;  %v893_v27 = vld [vmem:[#allocation16] sm:$0xff]  ;;  %v496_v28 = vperm.slane %v1308_v12, 4 }
  0x34   :  { %386 = vmatpush.bf16.msra.mxu2 %v874_v20  ;;  %v415_v20 = vperm.slane %v1308_v12, 3 }
  0x35   :  { %278 = vmatpush.bf16.msra.mxu1 %v865_v6 }
  0x36   :  { %546 = vmatpush.bf16.msrb.mxu0 %v891_v0 }
  0x37   :  { %466 = vmatpush.bf16.msra.mxu3 %v882_v33 }
  0x38   :  { %387 = vmatpush.bf16.msra.mxu2 %v873_v21 }
  0x39   :  { %279 = vmatpush.bf16.msra.mxu1 %v864_v7 }
  0x3a   :  { %547 = vmatpush.bf16.msrb.mxu0 %v890_v1 }
  0x3b   :  { %467 = vmatpush.bf16.msra.mxu3 %v881_v38 }
  0x3c   :  { %388 = vmatpush.bf16.msra.mxu2 %v872_v22 }
  0x3d   :  { %280 = vmatpush.bf16.msra.mxu1 %v863_v8 }
  0x3e   :  { %548 = vmatpush.bf16.msrb.mxu0 %v889_v2 }
  0x3f   :  { %468 = vmatpush.bf16.msra.mxu3 %v880_v44 }
  0x40   :  { %389 = vmatpush.bf16.msra.mxu2 %v871_v23 }
  0x41   :  { %281 = vmatpush.bf16.msra.mxu1 %v862_v9 }
  0x42   :  { %549 = vmatpush.bf16.msrb.mxu0 %v888_v3 }
  0x43   :  { %469 = vmatpush.bf16.msra.mxu3 %v879_v49 }
  0x44   :  { %390 = vmatpush.bf16.msra.mxu2 %v870_v24 }
  0x45   :  { %282 = vmatpush.bf16.msra.mxu1 %v861_v10 }
  0x46   :  { %550 = vmatpush.bf16.msrb.mxu0 %v887_v4 }
  0x47   :  { %470 = vmatpush.bf16.msra.mxu3 %v878_v61 }
  0x48   :  { %391 = vmatpush.bf16.msra.mxu2 %v869_v25 }
  0x4a   :  { %551 = vmatpush.bf16.msrb.mxu0 %v886_v11 }
  0x4b   :  { %471 = vmatpush.bf16.msra.mxu3 %v877_v62 }
  0xac   :  { %v204_v14 = vpop.f32.mrf.mxu0 }
  0xad   :  { %v205_v15 = vadd.f32 %v204_v14, %v178_v13  ;;  %v885_v13 = vld [vmem:[#allocation14] sm:$0xff]  ;;  %v900_v14 = vld [vmem:[#allocation16 + $0x38] sm:$0xff] }
  0xae   :  { %552 = vmatpush.bf16.msrb.mxu0 %v885_v13  ;;  %625 = vmatpush.bf16.msrb.mxu1 %v900_v14 }
  0xaf   :  { %v208_v16 = vmax.f32 %v205_v15, 0.0  ;;  %v899_v15 = vld [vmem:[#allocation16 + $0x30] sm:$0xff] }
  0xb1   :  { %v209_v17 = vpack.c.bf16 %v208_v16, %v208_v16  ;;  %v898_v16 = vld [vmem:[#allocation16 + $0x28] sm:$0xff] }
  0xb2   :  { %626 = vmatpush.bf16.msrb.mxu1 %v899_v15 }
  0xb3   :  { %283 = vmatmul.bf16.vlgmr.msra.gmra.mxu1 %v209_v17  ;;  %v897_v17 = vld [vmem:[#allocation16 + $0x20] sm:$0xff] }
  0xb4   :  { %v206_v18 = vpop.f32.mrf.mxu0 }
  0xb5   :  { %v896_v18 = vld [vmem:[#allocation16 + $0x18] sm:$0xff] }
  0xb6   :  { %627 = vmatpush.bf16.msrb.mxu1 %v898_v16 }
  0xba   :  { %628 = vmatpush.bf16.msrb.mxu1 %v897_v17 }
  0xbe   :  { %629 = vmatpush.bf16.msrb.mxu1 %v896_v18 }
  0xc2   :  { %630 = vmatpush.bf16.msrb.mxu1 %v895_v19 }
 0x130   :  { %v284_v29 = vpop.f32.mrf.mxu1 }
 0x131   :  { %v285_v30 = vadd.f32 %v284_v29, %v226_v26  ;;  %v894_v26 = vld [vmem:[#allocation16 + $0x8] sm:$0xff] }
 0x132   :  { %631 = vmatpush.bf16.msrb.mxu1 %v894_v26 }
 0x133   :  { %v288_v32 = vmax.f32 %v285_v30, 0.0 }
 0x135   :  { %v290_v34 = vrot.slane %v288_v32, 4  ;;  %v292_v35 = vmul.f32 %v288_v32, %v172_v31 }
 0x136   :  { %632 = vmatpush.bf16.msrb.mxu1 %v893_v27 }
 0x137   :  { %v293_v36 = vmul.f32 %v290_v34, %v172_v31  ;;  %v295_v37 = vsel %vm294_vm1, %v292_v35, 0.0  ;;  %v576_v34 = vperm.slane %v1308_v12, 5 }
 0x138   :  { %v296_v39 = vrot.slane %v295_v37, 4  ;;  %v286_v40 = vpop.f32.mrf.mxu1 }
 0x139   :  { %v302_v41 = vsel %vm294_vm1, %v293_v36, 0.0 }
 0x13a   :  { %v297_v42 = vadd.f32 %v296_v39, %v295_v37  ;;  %v303_v43 = vrot.slane %v302_v41, 4  ;;  %v639_v37 = vperm.slane %v1308_v12, 6 }
 0x13c   :  { %v298_v45 = vrot.slane %v297_v42, 2  ;;  %v304_v46 = vadd.f32 %v303_v43, %v302_v41  ;;  %v645_v43 = vperm.slane %v1308_v12, 7 }
 0x13e   :  { %v299_v47 = vadd.f32 %v298_v45, %v297_v42  ;;  %v305_v48 = vrot.slane %v304_v46, 2  ;;  %v1205_v42 = vmov 0  }
 0x13f   :  { %915 = vset.pattern.permute.xlu0 %v1205_v42 }
 0x140   :  { %v300_v50 = vrot.slane %v299_v47, 1  ;;  %v306_v51 = vadd.f32 %v305_v48, %v304_v46 }
 0x142   :  { %v301_v52 = vadd.f32 %v300_v50, %v299_v47  ;;  %v307_v53 = vrot.slane %v306_v51, 1 }
 0x144   :  { %v308_v54 = vadd.f32 %v307_v53, %v306_v51  ;;  %v309_v55 = vpack.c.bf16 %v301_v52, %v301_v52 }
 0x146   :  { %v310_v56 = vpack.c.bf16 %v308_v54, %v308_v54  ;;  %v330_v57 = vunpack.c.l.b16 %v309_v55 }
 0x148   :  { %v331_v58 = vunpack.c.l.b16 %v310_v56 }
 0x14a   :  { %v333_v59 = vsel %vm332_vm2, %v331_v58, %v330_v57 }
 0x14b   :  { %v334_v60 = vpack.c.b16 %v333_v59, %v333_v59 }
 0x14d   :  { %392 = vmatmul.bf16.vlgmr.msra.gmra.mxu2 %v334_v60 }
 0x1d0   :  { %v393_v6 = vpop.f32.mrf.mxu2 }
 0x1d1   :  { %v394_v7 = vadd.f32 %v393_v6, %v327_v5 }
 0x1d3   :  { %v397_v8 = vmax.f32 %v394_v7, 0.0 }
 0x1d5   :  { %v398_v9 = vpack.c.bf16 %v397_v8, %v397_v8 }
 0x1d7   :  { %472 = vmatmul.bf16.vlgmr.msra.gmra.mxu3 %v398_v9 }
 0x1d8   :  { %v395_v10 = vpop.f32.mrf.mxu2 }
 0x25a   :  { %v473_v21 = vpop.f32.mrf.mxu3 }
 0x25b   :  { %v474_v22 = vadd.f32 %v473_v21, %v415_v20 }
 0x25d   :  { %v477_v23 = vmax.f32 %v474_v22, 0.0 }
 0x25f   :  { %478 = vst [vmem:[#allocation17] sm:$0x3] %v477_v23  ;;  %v479_v24 = vpack.c.bf16 %v477_v23, %v477_v23 }
 0x260   :  { %663 = dma.vmem_to_hbm [thread:$0]  %s659_s23, 32, %s661_s13, [#allocation4]  }
 0x261   :  { %553 = vmatmul.bf16.vlgmr.msrb.gmra.mxu0 %v479_v24 }
 0x262   :  { %v475_v25 = vpop.f32.mrf.mxu3 }
 0x2de   :  { %v554_v29 = vpop.f32.mrf.mxu0 }
 0x2df   :  { %v555_v30 = vadd.f32 %v554_v29, %v496_v28 }
 0x2e1   :  { %v558_v31 = vmax.f32 %v555_v30, 0.0 }
 0x2e3   :  { %v559_v32 = vpack.c.bf16 %v558_v31, %v558_v31 }
 0x2e5   :  { %633 = vmatmul.bf16.vlgmr.msrb.gmra.mxu1 %v559_v32 }
 0x2e6   :  { %v556_v33 = vpop.f32.mrf.mxu0 }
 0x362   :  { %v634_v35 = vpop.f32.mrf.mxu1 }
 0x363   :  { %v635_v36 = vadd.f32 %v634_v35, %v576_v34 }
 0x365   :  { %v638_v38 = vmax.f32 %v635_v36, 0.0 }
 0x367   :  { %v640_v39 = vmul.f32 %v639_v37, %v638_v38 }
 0x369   :  { %v642_v40 = vsel %vm641_vm3, %v640_v39, 0.0 }
 0x36a   :  { %v636_v41 = vpop.f32.mrf.mxu1  ;;  %643 = vadd.xlane.f32.xlu0 %v642_v40 }
 0x3dd   :  { %v644_v44 = vpop.xlane.xlu0 %643 }
 0x3de   :  { %v646_v45 = vadd.f32 %v645_v43, %v644_v44 }
 0x3e0   :  { %649 = vperm.xlu0 %915, %v646_v45  }
 0x452   :  { %v650_v46 = vpop.permute.xlu0 %649 }
 0x453   :  { %652 = vst [vmem:[#allocation18] sm:$0x3] %v650_v46 }
 0x454   :  { %674 = dma.vmem_to_hbm [thread:$0]  %s670_s15, 32, %s672_s7, [#allocation19]  }
 0x455   :  { %1190 = dma.done.wait [#allocation4], 32  }
 0x456   :  { %1191 = vsyncadd [#allocation4], 4294967264 }
 0x457   :  { %1192 = dma.done.wait [#allocation19], 32  }
 0x458   :  { %1193 = vsyncadd [#allocation19], 4294967264 }
 0x459   :  { %683 = vsyncpa [#allocation3], 1 }
 0x45a   :  { %684 = vsyncpa [#allocation6], 1 }
 0x45b   :  { %685 = vsyncpa [#allocation9], 1 }
 0x45c   :  { %686 = vsyncpa [#allocation12], 1 }
 0x45d   :  { %687 = vsyncpa [#allocation15], 1 }
 0x45e   :  { %688 = vsyncpa [#allocation4], 1 }
 0x45f   :  { %689 = vsyncpa [#allocation19], 1 }

</bundles_post_ra>
